<compile_context>
chip_gen: v5e
topology: v5e:2x2
jax: 0.10.0
libtpu: 0.0.40
codegen_flags: <defaults>
</compile_context>

<pallas_src>
import functools

import jax
import jax.numpy as jnp
from jax import lax
from jax.experimental import pallas as pl
from jax.experimental.pallas import tpu as pltpu


# ----------------------------------------------------------------------------
# Pallas kernel
# ----------------------------------------------------------------------------
def _reg_loss_kernel(ind_ref, feat_ref, target_ref, mask_ref, out_ref,
                     gathered_ref, *, max_objs):
    """Grid = (B,).  For batch element b:
         out[b, 0, :] = sum_k smooth_l1( mask[b,k] *
                                         (feat[b, ind[b,k], :] - target[b,k,:]) )
       (per-channel partial sums; final reduction + normalization in JAX).
    """
    b = pl.program_id(0)
    C = out_ref.shape[-1]

    # --- Phase 1: data-dependent gather into a (K, C) VMEM scratch ---------
    def gather_body(k, carry):
        idx = ind_ref[b, k]                                  # scalar from SMEM
        gathered_ref[pl.ds(k, 1), :] = feat_ref[0, pl.ds(idx, 1), :]
        return carry

    lax.fori_loop(0, max_objs, gather_body, 0, unroll=True)

    # --- Phase 2: one vectorized masked smooth-L1 pass over (K, C) ---------
    pred = gathered_ref[...]                                 # (K, C)
    tgt = target_ref[0]                                      # (K, C)
    m = mask_ref[0]                                          # (K, 1) -> bcast C
    x = (pred - tgt) * m
    ax = jnp.abs(x)
    # smooth_l1 with beta = 1.0 (F.smooth_l1_loss default)
    sl1 = jnp.where(ax < 1.0, 0.5 * x * x, ax - 0.5)
    out_ref[...] = jnp.sum(sl1, axis=0, keepdims=True).reshape(1, 1, C)


# ----------------------------------------------------------------------------
# Wrapper (JAX glue + pallas_call)
# ----------------------------------------------------------------------------
def reg_loss(output, mask, ind, target):
    """output: [B, C, H, W], mask: [B, K], ind: [B, K], target: [B, K, C]."""
    B, C, H, W = output.shape
    _, K, Ct = target.shape
    assert Ct == C

    # _transpose_and_gather_feat layout glue: NCHW -> [B, H*W, C]
    # (the actual gather over `ind` happens inside the kernel).
    feat = jnp.transpose(output, (0, 2, 3, 1)).reshape(B, H * W, C)
    feat = feat.astype(jnp.float32)
    target_f = target.astype(jnp.float32)
    mask_f = mask.astype(jnp.float32)
    mask_col = mask_f.reshape(B, K, 1)
    ind32 = ind.astype(jnp.int32)

    kernel = functools.partial(_reg_loss_kernel, max_objs=K)

    partial_sums = pl.pallas_call(
        kernel,
        out_shape=jax.ShapeDtypeStruct((B, 1, C), jnp.float32),
        grid_spec=pltpu.PrefetchScalarGridSpec(
            num_scalar_prefetch=1,                  # ind -> SMEM, visible in-kernel
            grid=(B,),
            in_specs=[
                pl.BlockSpec((1, H * W, C), lambda b, ind_s: (b, 0, 0)),   # feat
                pl.BlockSpec((1, K, C), lambda b, ind_s: (b, 0, 0)),       # target
                pl.BlockSpec((1, K, 1), lambda b, ind_s: (b, 0, 0)),       # mask
            ],
            out_specs=pl.BlockSpec((1, 1, C), lambda b, ind_s: (b, 0, 0)),
            scratch_shapes=[pltpu.VMEM((K, C), jnp.float32)],
        ),
        compiler_params=pltpu.CompilerParams(
            dimension_semantics=("parallel",)),
    )(ind32, feat, target_f, mask_col)

    num = jnp.sum(mask_f)
    loss = jnp.sum(partial_sums) / (num + jnp.float32(1e-4))
    return loss


# ----------------------------------------------------------------------------
# Pure-JAX reference (mirrors the PyTorch code) for verification
# ----------------------------------------------------------------------------
def reg_loss_ref(output, mask, ind, target):
    B, C, H, W = output.shape
    feat = jnp.transpose(output, (0, 2, 3, 1)).reshape(B, H * W, C)
    pred = jnp.take_along_axis(feat, ind[:, :, None], axis=1)      # [B, K, C]
    m = mask[:, :, None].astype(jnp.float32)
    x = pred.astype(jnp.float32) * m - target.astype(jnp.float32) * m
    ax = jnp.abs(x)
    sl1 = jnp.where(ax < 1.0, 0.5 * x * x, ax - 0.5)
    num = jnp.sum(mask.astype(jnp.float32))
    return jnp.sum(sl1) / (num + 1e-4)


# ----------------------------------------------------------------------------
if __name__ == "__main__":
    B, C, H, W = 2, 4, 16, 16      # output: [batch, dim, h, w]
    K = 8                          # max_objects

    key = jax.random.PRNGKey(0)
    k0, k1, k2, k3 = jax.random.split(key, 4)
    output = jax.random.normal(k0, (B, C, H, W), jnp.float32)
    mask = (jax.random.uniform(k1, (B, K)) > 0.3).astype(jnp.float32)
    ind = jax.random.randint(k2, (B, K), 0, H * W, dtype=jnp.int32)
    target = jax.random.normal(k3, (B, K, C), jnp.float32)

    loss = reg_loss(output, mask, ind, target)
    loss = jax.block_until_ready(loss)

    ref = float(jax.block_until_ready(reg_loss_ref(output, mask, ind, target)))
    got = float(loss)
    assert abs(got - ref) <= 1e-4 * max(1.0, abs(ref)), (got, ref)

    print("KERNEL_OK")
</pallas_src>

<mosaic_0001>
module attributes {stable_mosaic.version = 11 : i64} {
  func.func @_reg_loss_kernel(%arg0: i32, %arg1: memref<2x8xi32, #tpu.memory_space<smem>>, %arg2: memref<1x256x4xf32, #tpu.memory_space<vmem>>, %arg3: memref<1x8x4xf32, #tpu.memory_space<vmem>>, %arg4: memref<1x8x1xf32, #tpu.memory_space<vmem>>, %arg5: memref<1x1x4xf32, #tpu.memory_space<vmem>>, %arg6: memref<8x4xf32, #tpu.memory_space<vmem>>) attributes {dimension_semantics = [#tpu.dimension_semantics<parallel>], iteration_bounds = array<i64: 2>, scalar_prefetch = 1 : i64, scratch_operands = 1 : i64, tpu.core_type = #tpu.core_type<tc>, window_params = [{transform_indices = @transform_0, window_bounds = array<i64: 1, 256, 4>}, {transform_indices = @transform_1, window_bounds = array<i64: 1, 8, 4>}, {transform_indices = @transform_2, window_bounds = array<i64: 1, 8, 1>}, {transform_indices = @transform_3, window_bounds = array<i64: 1, 1, 4>}]} {
    %c0_i32 = arith.constant 0 : i32
    %0 = arith.index_cast %arg0 : i32 to index
    %1 = arith.index_cast %c0_i32 : i32 to index
    %2 = memref.load %arg1[%0, %1] : memref<2x8xi32, #tpu.memory_space<smem>>
    %c0 = arith.constant 0 : index
    %3 = arith.index_cast %2 : i32 to index
    %c0_0 = arith.constant 0 : index
    %4 = vector.load %arg2[%c0, %3, %c0_0] : memref<1x256x4xf32, #tpu.memory_space<vmem>>, vector<1x1x4xf32>
    %5 = vector.shape_cast %4 : vector<1x1x4xf32> to vector<1x4xf32>
    %6 = arith.index_cast %c0_i32 : i32 to index
    %c0_1 = arith.constant 0 : index
    %7 = vector.load %arg6[%6, %c0_1] : memref<8x4xf32, #tpu.memory_space<vmem>>, vector<1x4xf32>
    tpu.vector_store %arg6[%6, %c0_1], %5 {strides = array<i32>} : memref<8x4xf32, #tpu.memory_space<vmem>>, vector<1x4xf32>,
    %c1_i32 = arith.constant 1 : i32
    %8 = arith.index_cast %arg0 : i32 to index
    %9 = arith.index_cast %c1_i32 : i32 to index
    %10 = memref.load %arg1[%8, %9] : memref<2x8xi32, #tpu.memory_space<smem>>
    %c0_2 = arith.constant 0 : index
    %11 = arith.index_cast %10 : i32 to index
    %c0_3 = arith.constant 0 : index
    %12 = vector.load %arg2[%c0_2, %11, %c0_3] : memref<1x256x4xf32, #tpu.memory_space<vmem>>, vector<1x1x4xf32>
    %13 = vector.shape_cast %12 : vector<1x1x4xf32> to vector<1x4xf32>
    %14 = arith.index_cast %c1_i32 : i32 to index
    %c0_4 = arith.constant 0 : index
    %15 = vector.load %arg6[%14, %c0_4] : memref<8x4xf32, #tpu.memory_space<vmem>>, vector<1x4xf32>
    tpu.vector_store %arg6[%14, %c0_4], %13 {strides = array<i32>} : memref<8x4xf32, #tpu.memory_space<vmem>>, vector<1x4xf32>,
    %c2_i32 = arith.constant 2 : i32
    %16 = arith.index_cast %arg0 : i32 to index
    %17 = arith.index_cast %c2_i32 : i32 to index
    %18 = memref.load %arg1[%16, %17] : memref<2x8xi32, #tpu.memory_space<smem>>
    %c0_5 = arith.constant 0 : index
    %19 = arith.index_cast %18 : i32 to index
    %c0_6 = arith.constant 0 : index
    %20 = vector.load %arg2[%c0_5, %19, %c0_6] : memref<1x256x4xf32, #tpu.memory_space<vmem>>, vector<1x1x4xf32>
    %21 = vector.shape_cast %20 : vector<1x1x4xf32> to vector<1x4xf32>
    %22 = arith.index_cast %c2_i32 : i32 to index
    %c0_7 = arith.constant 0 : index
    %23 = vector.load %arg6[%22, %c0_7] : memref<8x4xf32, #tpu.memory_space<vmem>>, vector<1x4xf32>
    tpu.vector_store %arg6[%22, %c0_7], %21 {strides = array<i32>} : memref<8x4xf32, #tpu.memory_space<vmem>>, vector<1x4xf32>,
    %c3_i32 = arith.constant 3 : i32
    %24 = arith.index_cast %arg0 : i32 to index
    %25 = arith.index_cast %c3_i32 : i32 to index
    %26 = memref.load %arg1[%24, %25] : memref<2x8xi32, #tpu.memory_space<smem>>
    %c0_8 = arith.constant 0 : index
    %27 = arith.index_cast %26 : i32 to index
    %c0_9 = arith.constant 0 : index
    %28 = vector.load %arg2[%c0_8, %27, %c0_9] : memref<1x256x4xf32, #tpu.memory_space<vmem>>, vector<1x1x4xf32>
    %29 = vector.shape_cast %28 : vector<1x1x4xf32> to vector<1x4xf32>
    %30 = arith.index_cast %c3_i32 : i32 to index
    %c0_10 = arith.constant 0 : index
    %31 = vector.load %arg6[%30, %c0_10] : memref<8x4xf32, #tpu.memory_space<vmem>>, vector<1x4xf32>
    tpu.vector_store %arg6[%30, %c0_10], %29 {strides = array<i32>} : memref<8x4xf32, #tpu.memory_space<vmem>>, vector<1x4xf32>,
    %c4_i32 = arith.constant 4 : i32
    %32 = arith.index_cast %arg0 : i32 to index
    %33 = arith.index_cast %c4_i32 : i32 to index
    %34 = memref.load %arg1[%32, %33] : memref<2x8xi32, #tpu.memory_space<smem>>
    %c0_11 = arith.constant 0 : index
    %35 = arith.index_cast %34 : i32 to index
    %c0_12 = arith.constant 0 : index
    %36 = vector.load %arg2[%c0_11, %35, %c0_12] : memref<1x256x4xf32, #tpu.memory_space<vmem>>, vector<1x1x4xf32>
    %37 = vector.shape_cast %36 : vector<1x1x4xf32> to vector<1x4xf32>
    %38 = arith.index_cast %c4_i32 : i32 to index
    %c0_13 = arith.constant 0 : index
    %39 = vector.load %arg6[%38, %c0_13] : memref<8x4xf32, #tpu.memory_space<vmem>>, vector<1x4xf32>
    tpu.vector_store %arg6[%38, %c0_13], %37 {strides = array<i32>} : memref<8x4xf32, #tpu.memory_space<vmem>>, vector<1x4xf32>,
    %c5_i32 = arith.constant 5 : i32
    %40 = arith.index_cast %arg0 : i32 to index
    %41 = arith.index_cast %c5_i32 : i32 to index
    %42 = memref.load %arg1[%40, %41] : memref<2x8xi32, #tpu.memory_space<smem>>
    %c0_14 = arith.constant 0 : index
    %43 = arith.index_cast %42 : i32 to index
    %c0_15 = arith.constant 0 : index
    %44 = vector.load %arg2[%c0_14, %43, %c0_15] : memref<1x256x4xf32, #tpu.memory_space<vmem>>, vector<1x1x4xf32>
    %45 = vector.shape_cast %44 : vector<1x1x4xf32> to vector<1x4xf32>
    %46 = arith.index_cast %c5_i32 : i32 to index
    %c0_16 = arith.constant 0 : index
    %47 = vector.load %arg6[%46, %c0_16] : memref<8x4xf32, #tpu.memory_space<vmem>>, vector<1x4xf32>
    tpu.vector_store %arg6[%46, %c0_16], %45 {strides = array<i32>} : memref<8x4xf32, #tpu.memory_space<vmem>>, vector<1x4xf32>,
    %c6_i32 = arith.constant 6 : i32
    %48 = arith.index_cast %arg0 : i32 to index
    %49 = arith.index_cast %c6_i32 : i32 to index
    %50 = memref.load %arg1[%48, %49] : memref<2x8xi32, #tpu.memory_space<smem>>
    %c0_17 = arith.constant 0 : index
    %51 = arith.index_cast %50 : i32 to index
    %c0_18 = arith.constant 0 : index
    %52 = vector.load %arg2[%c0_17, %51, %c0_18] : memref<1x256x4xf32, #tpu.memory_space<vmem>>, vector<1x1x4xf32>
    %53 = vector.shape_cast %52 : vector<1x1x4xf32> to vector<1x4xf32>
    %54 = arith.index_cast %c6_i32 : i32 to index
    %c0_19 = arith.constant 0 : index
    %55 = vector.load %arg6[%54, %c0_19] : memref<8x4xf32, #tpu.memory_space<vmem>>, vector<1x4xf32>
    tpu.vector_store %arg6[%54, %c0_19], %53 {strides = array<i32>} : memref<8x4xf32, #tpu.memory_space<vmem>>, vector<1x4xf32>,
    %c7_i32 = arith.constant 7 : i32
    %56 = arith.index_cast %arg0 : i32 to index
    %57 = arith.index_cast %c7_i32 : i32 to index
    %58 = memref.load %arg1[%56, %57] : memref<2x8xi32, #tpu.memory_space<smem>>
    %c0_20 = arith.constant 0 : index
    %59 = arith.index_cast %58 : i32 to index
    %c0_21 = arith.constant 0 : index
    %60 = vector.load %arg2[%c0_20, %59, %c0_21] : memref<1x256x4xf32, #tpu.memory_space<vmem>>, vector<1x1x4xf32>
    %61 = vector.shape_cast %60 : vector<1x1x4xf32> to vector<1x4xf32>
    %62 = arith.index_cast %c7_i32 : i32 to index
    %c0_22 = arith.constant 0 : index
    %63 = vector.load %arg6[%62, %c0_22] : memref<8x4xf32, #tpu.memory_space<vmem>>, vector<1x4xf32>
    tpu.vector_store %arg6[%62, %c0_22], %61 {strides = array<i32>} : memref<8x4xf32, #tpu.memory_space<vmem>>, vector<1x4xf32>,
    %c8_i32 = arith.constant 8 : i32
    %c0_23 = arith.constant 0 : index
    %c0_24 = arith.constant 0 : index
    %64 = vector.load %arg6[%c0_23, %c0_24] : memref<8x4xf32, #tpu.memory_space<vmem>>, vector<8x4xf32>
    %c0_25 = arith.constant 0 : index
    %c0_26 = arith.constant 0 : index
    %c0_27 = arith.constant 0 : index
    %65 = vector.load %arg3[%c0_25, %c0_26, %c0_27] : memref<1x8x4xf32, #tpu.memory_space<vmem>>, vector<1x8x4xf32>
    %66 = vector.shape_cast %65 : vector<1x8x4xf32> to vector<8x4xf32>
    %c0_28 = arith.constant 0 : index
    %c0_29 = arith.constant 0 : index
    %c0_30 = arith.constant 0 : index
    %67 = vector.load %arg4[%c0_28, %c0_29, %c0_30] : memref<1x8x1xf32, #tpu.memory_space<vmem>>, vector<1x8x1xf32>
    %68 = vector.shape_cast %67 : vector<1x8x1xf32> to vector<8x1xf32>
    %69 = arith.subf %64, %66 : vector<8x4xf32>
    %70 = vector.broadcast %68 : vector<8x1xf32> to vector<8x4xf32>
    %71 = arith.mulf %69, %70 : vector<8x4xf32>
    %72 = math.absf %71 : vector<8x4xf32>
    %cst = arith.constant 1.000000e+00 : f32
    %73 = vector.broadcast %cst : f32 to vector<8x4xf32>
    %74 = arith.cmpf olt, %72, %73 : vector<8x4xf32>
    %cst_31 = arith.constant 5.000000e-01 : f32
    %75 = vector.broadcast %cst_31 : f32 to vector<8x4xf32>
    %76 = arith.mulf %75, %71 : vector<8x4xf32>
    %77 = arith.mulf %76, %71 : vector<8x4xf32>
    %cst_32 = arith.constant 5.000000e-01 : f32
    %78 = vector.broadcast %cst_32 : f32 to vector<8x4xf32>
    %79 = arith.subf %72, %78 : vector<8x4xf32>
    %80 = arith.select %74, %77, %79 : vector<8x4xi1>, vector<8x4xf32>
    %cst_33 = arith.constant dense<0.000000e+00> : vector<4xf32>
    %81 = vector.multi_reduction <add>, %80, %cst_33 [0] : vector<8x4xf32> to vector<4xf32>
    %82 = vector.shape_cast %81 : vector<4xf32> to vector<1x4xf32>
    %83 = vector.shape_cast %82 : vector<1x4xf32> to vector<1x1x4xf32>
    %c0_34 = arith.constant 0 : index
    %c0_35 = arith.constant 0 : index
    %c0_36 = arith.constant 0 : index
    %84 = vector.load %arg5[%c0_34, %c0_35, %c0_36] : memref<1x1x4xf32, #tpu.memory_space<vmem>>, vector<1x1x4xf32>
    tpu.vector_store %arg5[%c0_34, %c0_35, %c0_36], %83 {strides = array<i32>} : memref<1x1x4xf32, #tpu.memory_space<vmem>>, vector<1x1x4xf32>,
    return
  }
  func.func @transform_0(%arg0: i32, %arg1: memref<2x8xi32, #tpu.memory_space<smem>>) -> (i32, i32, i32) {
    %c0_i32 = arith.constant 0 : i32
    %c0_i32_0 = arith.constant 0 : i32
    %c0_i32_1 = arith.constant 0 : i32
    return %arg0, %c0_i32, %c0_i32_0 : i32, i32, i32
  }
  func.func @transform_1(%arg0: i32, %arg1: memref<2x8xi32, #tpu.memory_space<smem>>) -> (i32, i32, i32) {
    %c0_i32 = arith.constant 0 : i32
    %c0_i32_0 = arith.constant 0 : i32
    %c0_i32_1 = arith.constant 0 : i32
    return %arg0, %c0_i32, %c0_i32_0 : i32, i32, i32
  }
  func.func @transform_2(%arg0: i32, %arg1: memref<2x8xi32, #tpu.memory_space<smem>>) -> (i32, i32, i32) {
    %c0_i32 = arith.constant 0 : i32
    %c0_i32_0 = arith.constant 0 : i32
    %c0_i32_1 = arith.constant 0 : i32
    return %arg0, %c0_i32, %c0_i32_0 : i32, i32, i32
  }
  func.func @transform_3(%arg0: i32, %arg1: memref<2x8xi32, #tpu.memory_space<smem>>) -> (i32, i32, i32) {
    %c0_i32 = arith.constant 0 : i32
    %c0_i32_0 = arith.constant 0 : i32
    %c0_i32_1 = arith.constant 0 : i32
    return %arg0, %c0_i32, %c0_i32_0 : i32, i32, i32
  }
}

</mosaic_0001>

<bundles_post_ra>
// kernel: tpu_custom_call.1
= control target key start
LH: loop header
LB: loop body
LE: loop exit
PB: predicated region body
PF: predicated region fallthrough
CT: control target
= control target key end

     0   :  { %s510_s18 = smov [#allocation4]   ;;  %s649_s0 = inlined_call_operand.vmem [shape: s32[2,8], index: 0, kind: input, shape index: {}]   ;;  %s650_s1 = inlined_call_operand.vmem [shape: f32[2,256,4], index: 1, kind: input, shape index: {}]   ;;  %s651_s2 = inlined_call_operand.vmem [shape: f32[2,8,4], index: 2, kind: input, shape index: {}]   ;;  %s652_s3 = inlined_call_operand.vmem [shape: f32[2,8,1], index: 3, kind: input, shape index: {}]   ;;  %s653_s4 = inlined_call_operand.hbm [shape: f32[2,1,4], index: 4, kind: output, shape index: {}]  }
   0x1   :  { %s10_s17 = sshll.u32 %s649_s0, 4  ;;  %s11_s17 = int_to_ptr.vmem [resolvable:$true] %s10_s17 }
   0x2   :  { %13 = dma.vmem_to_smem %s11_s17, 32, %s510_s18, [#allocation3] }
   0x3   :  { %488 = dma.done.wait [#allocation3], 32 }
   0x4   :  { %489 = vsyncadd [#allocation3], 4294967264 }
   0x5   :  { %16 = sfence }
   0x6   :  { %17 = vsyncpa [#allocation6], 0 }
   0x7   :  { %19 = vsyncpa [#allocation6 + $0x1], 0  ;;  %s540_s19 = smov 0   ;;  %s542_s20 = smov 0  }
   0x8   :  { %s544_s21 = smov 0   ;;  %s546_s22 = smov 0  }
   0x9 LB: > { %659 = sst [smem:[#allocation9_spill]] %s496_s19  ;;  %s561_s0 = sadd.s32 4294967295, %s508_s22   ;;  %s508_s22 = sphi %s546_s22, %s668_s22   ;;  %s504_s21 = sphi %s544_s21, %s670_s21   ;;  %s500_s20 = sphi %s542_s20, %s672_s20   ;;  %s496_s19 = sphi %s540_s19, %s671_s19  }
   0xa   : > { %660 = sst [smem:[#allocation10_spill]] %s504_s21  ;;  %s377_s23 = sadd.s32 4294967294, %s508_s22  }
   0xb   : > { %s565_s24 = sadd.s32 1, %s508_s22   ;;  %s110_s25 = sadd.s32 1, %s504_s21 }
   0xc   : > { %661 = sst [smem:[#allocation11_spill]] %s565_s24  ;;  %s107_s26 = ssub.s32 %s508_s22, %s565_s24 }
   0xd   : > { %p120_p0 = scmp.ne.s32.totalorder %s504_s21, %s500_s20  ;;  %p108_p1 = scmp.eq.s32.totalorder %s107_s26, 0 }
   0xe   : > { %p121_p2 = scmp.eq.s32.totalorder %s561_s0, 1  ;;  %p126_p3 = scmp.ne.s32.totalorder %s500_s20, %s496_s19 }
   0xf   : > { %p127_p4 = scmp.eq.s32.totalorder %s377_s23, 1  ;;  %p380_p7 = scmp.ge.s32.totalorder %s508_s22, 1 }
  0x10   : > { %s576_s27 = scalar_select %p108_p1, %s504_s21, %s110_s25  }
  0x11   : > { %p578_p5 = por %p121_p2, %p120_p0  ;;  %p582_p6 = por %p127_p4, %p126_p3 }
  0x12   : > { %662 = sst [smem:[#allocation12_spill]] %s576_s27  ;;  %p167_p8 = scmp.lt.s32.totalorder %s508_s22, 3 }
  0x13   : > { %s664_s29 = scalar_select %p582_p6, 1, 0 }
  0x14   : > { %p168_p9 = pnand %p380_p7, %p167_p8 }
  0x15   : > { %665 = sst [smem:[#allocation13_spill]] %s664_s29  ;;  %p198_p10 = scmp.lt.s32.totalorder (!%p168_p9), %s561_s0, 1 }
  0x16   : > { %171 = sbr.rel (%p168_p9) target bundleno = 170 (0xaa), region = 32  ;;  %s385_s30 = sshll.u32 (!%p168_p9), %s561_s0, 7 }
  0x17   : > { %s212_s5 = sld [smem:[#allocation4 + %s385_s30]] (!%p168_p9)  ;;  %s217_s6 = sadd.s32 (!%p168_p9), 1, %s385_s30 }
  0x18   : > { %s218_s8 = sld [smem:[#allocation4 + %s217_s6]] (!%p168_p9)  ;;  %s222_s9 = sadd.s32 (!%p168_p9), 2, %s385_s30 }
  0x19   : > { %s223_s11 = sld [smem:[#allocation4 + %s222_s9]] (!%p168_p9)  ;;  %s227_s15 = sadd.s32 (!%p168_p9), 3, %s385_s30 }
  0x1a   : > { %s228_s16 = sld [smem:[#allocation4 + %s227_s15]] (!%p168_p9)  ;;  %s232_s17 = sadd.s32 (!%p168_p9), 4, %s385_s30 }
  0x1b   : > { %v511_v0 = vmov 0   ;;  %s591_s7 = scalar_select %p198_p10, %s561_s0, 1  ;;  %vm215_vm0 = vcmask 24576   ;;  %vm268_vm1 = vcmask 31744  }
  0x1c   : > { %431 = vset.pattern.permute.xlu0 %v511_v0  ;;  %s233_s18 = sld [smem:[#allocation4 + %s232_s17]]  ;;  %s237_s23 = sadd.s32 5, %s385_s30 }
  0x1d   : > { %s383_s10 = sshll.u32 %s591_s7, 3  ;;  %s238_s25 = sld [smem:[#allocation4 + %s237_s23]] }
  0x1e   : > { %s210_s14 = scalar_lea.vmem %s652_s3, %s383_s10  ;;  %s242_s26 = sadd.s32 6, %s385_s30 }
  0x1f   : > { %v254_v1 = vld [vmem:[%s210_s14] sm:$0xff]  ;;  %s243_s27 = sld [smem:[#allocation4 + %s242_s26]]  ;;  %s247_s6 = sadd.s32 7, %s385_s30 }
  0x20   : > { %258 = vperm.xlu0 %431, %v254_v1   ;;  %s248_s21 = sld [smem:[#allocation4 + %s247_s6]]  ;;  %s389_s24 = sshll.u32 %s591_s7, 8 }
  0x21   : > { %s202_s19 = scalar_lea.vmem %s650_s1, %s389_s24  ;;  %s464_s9 = scalar_lea.hbm %s653_s4, 2 }
  0x22   : > { %s213_s12 = scalar_lea.vmem %s202_s19, %s212_s5  ;;  %s219_s13 = scalar_lea.vmem %s202_s19, %s218_s8 }
  0x23   : > { %v214_v2 = vld [vmem:[%s213_s12] sm:$0x1]  ;;  %s224_s15 = scalar_lea.vmem %s202_s19, %s223_s11  ;;  %s229_s14 = scalar_lea.vmem %s202_s19, %s228_s16 }
  0x24   : > { %v220_v3 = vld [vmem:[%s219_s13] sm:$0x1]  ;;  %216 = vst.msk [vmem:[#allocation2] sm:$0x1] %vm215_vm0, %v214_v2  ;;  %s234_s17 = scalar_lea.vmem %s202_s19, %s233_s18  ;;  %s239_s30 = scalar_lea.vmem %s202_s19, %s238_s25 }
  0x25   : > { %v225_v4 = vld [vmem:[%s224_s15] sm:$0x1]  ;;  %221 = vst.msk [vmem:[#allocation2 + $0x1] sm:$0x1] %vm215_vm0, %v220_v3  ;;  %s244_s23 = scalar_lea.vmem %s202_s19, %s243_s27  ;;  %s206_s27 = scalar_lea.vmem %s651_s2, %s383_s10 }
  0x26   : > { %v230_v5 = vld [vmem:[%s229_s14] sm:$0x1]  ;;  %226 = vst.msk [vmem:[#allocation2 + $0x2] sm:$0x1] %vm215_vm0, %v225_v4  ;;  %s249_s24 = scalar_lea.vmem %s202_s19, %s248_s21  ;;  %s196_s19 = sand.u32 1, %s500_s20  }
  0x27   : > { %v235_v6 = vld [vmem:[%s234_s17] sm:$0x1]  ;;  %231 = vst.msk [vmem:[#allocation2 + $0x3] sm:$0x1] %vm215_vm0, %v230_v5  ;;  %s286_s8 = scalar_lea.hbm %s653_s4, %s561_s0  ;;  %s197_s10 = scalar_lea.vmem [#allocation5], %s196_s19 }
  0x28   : > { %v240_v7 = vld [vmem:[%s239_s30] sm:$0x1]  ;;  %236 = vst.msk [vmem:[#allocation2 + $0x4] sm:$0x1] %vm215_vm0, %v235_v6  ;;  %s288_s11 = sshll.u32 %s197_s10, 4  ;;  %s290_s16 = sshll.u32 %s286_s8, 4  ;;  %s289_s11 = int_to_ptr.vmem [resolvable:$true] %s288_s11  ;;  %s291_s16 = int_to_ptr.hbm [resolvable:$true] %s290_s16 }
  0x29   : > { %v245_v8 = vld [vmem:[%s244_s23] sm:$0x1]  ;;  %241 = vst.msk [vmem:[#allocation2 + $0x5] sm:$0x1] %vm215_vm0, %v240_v7  ;;  %s278_s18 = scalar_lea.sflag [#allocation6], %s196_s19  ;;  %s458_s25 = sshra.s32 %s291_s16, 4  ;;  %s459_s25 = int_to_ptr.hbm [resolvable:$true] %s458_s25 }
  0x2a   : > { %v250_v9 = vld [vmem:[%s249_s24] sm:$0x1]  ;;  %246 = vst.msk [vmem:[#allocation2 + $0x6] sm:$0x1] %vm215_vm0, %v245_v8  ;;  %s460_s26 = scalar_lea.hbm %s459_s25, 1  ;;  %p465_p0 = scmp.lt.s32.totalorder %s459_s25, %s653_s4 }
  0x2b   : > { %251 = vst.msk [vmem:[#allocation2 + $0x7] sm:$0x1] %vm215_vm0, %v250_v9  ;;  %v253_v10 = vld [vmem:[%s206_s27] sm:$0xff]  ;;  %p461_p11 = scmp.ne.s32.totalorder %s459_s25, %s460_s26  ;;  %p466_p1 = scmp.lt.s32.totalorder %s464_s9, %s460_s26 }
  0x2d   : > { %p462_p12 = pnand %p461_p11, %p578_p5  ;;  %p467_p2 = por %p466_p1, %p465_p0 }
  0x2f   : > { %p463_p13 = pneg %p462_p12 }
  0x31   : > { %p468_p3 = pnand %p467_p2, %p463_p13 }
  0x32   : > { %v252_v11 = vld [vmem:[#allocation2] sm:$0xff] }
  0x33   : > { %v255_v12 = vsub.f32 %v252_v11, %v253_v10 }
  0x92   : > { %v259_v13 = vpop.permute.xlu0 %258 }
  0x93   : > { %v261_v14 = vmul.f32 %v259_v13, %v255_v12 }
  0x95   : > { %v262_v15 = vand.u32 2147483647, %v261_v14  ;;  %v264_v16 = vmul.f32 0.5, %v261_v14 }
  0x97   : > { %vm263_vm2 = vcmp.lt.f32.partialorder %v262_v15, 1.0  ;;  %v265_v17 = vmul.f32 %v264_v16, %v261_v14  ;;  %v386_v18 = vadd.f32 -0.5, %v262_v15 }
  0x99   : > { %v267_v19 = vsel %vm263_vm2, %v265_v17, %v386_v18 }
  0x9a   : > { %v269_v20 = vsel %vm268_vm1, %v267_v19, 0.0 }
  0x9b   : > { %v270_v21 = vrot.slane %v269_v20, 4 }
  0x9d   : > { %v271_v22 = vadd.f32 %v270_v21, %v269_v20 }
  0x9f   : > { %v272_v23 = vrot.slane %v271_v22, 2 }
  0xa1   : > { %v273_v24 = vadd.f32 %v272_v23, %v271_v22 }
  0xa3   : > { %v274_v25 = vrot.slane %v273_v24, 1 }
  0xa5   : > { %v275_v26 = vadd.f32 %v274_v25, %v273_v24 }
  0xa7   : > { %276 = vst.msk [vmem:[%s197_s10] sm:$0x1] %vm215_vm0, %v275_v26 }
  0xa8   : > { %471 = shalt.err (!%p468_p3)
}
  0xa9   : > { %390 = dma.vmem_to_hbm [thread:$0]  (%p578_p5), %s289_s11, 16, %s291_s16, %s278_s18  }
  0xaa PF: > { %s666_s15 = sld [smem:[#allocation9_spill]]  ;;  %p396_p4 = scmp.ge.s32.totalorder %s508_s22, 2 }
  0xac   : > { %p393_p7 = pnand %p396_p4, %p582_p6 }
  0xae   : > { %p394_p8 = pneg %p393_p7 }
  0xb0   : > { %s302_s17 = sand.u32 1, %s666_s15  }
  0xb1   : > { %s303_s30 = scalar_lea.sflag [#allocation6], %s302_s17 }
  0xb2   : > { %491 = dma.done.wait (%p394_p8), %s303_s30, 16  }
  0xb3   : > { %493 = vsyncadd (%p394_p8), %s303_s30, 4294967280  ;;  %s668_s22 = sld [smem:[#allocation11_spill]]  ;;  %s671_s19 = smov %s500_s20 }
  0xb4   : > { %s669_s23 = sld [smem:[#allocation10_spill]] }
  0xb5   : > { %s670_s21 = sld [smem:[#allocation12_spill]] }
  0xb9   : > { %p22_p9 = scmp.ge.s32.totalorder %s668_s22, 4  }
  0xba   : > { %s672_s20 = smov %s669_s23 }
  0xbb   :  { %24 = sbr.rel (!%p22_p9) target bundleno = 9 (0x9), region = 81 }
  0xc0   :  { %308 = vsyncpa [#allocation6], 1 }
  0xc1   :  { %310 = vsyncpa [#allocation6 + $0x1], 1 }

</bundles_post_ra>
